<compile_context>
chip_gen: v7x
topology: tpu7x:2x2x1
jax: 0.10.0
libtpu: 0.0.40
codegen_flags: <defaults>
</compile_context>

<pallas_src>
import jax
import jax.numpy as jnp
from jax.experimental import pallas as pl
from jax.experimental.pallas import tpu as pltpu

IN_DIM = 120 * 6        # 720 (module's true feature width)
IN_PAD = 768            # 6 * 128 -> lane-dense padded feature width
H_DIM = 128
LATENT = 64


def autoencoder_kernel(x_ref,
                       w1_ref, b1_ref,   # encoder layer 1: 768(pad) -> 128
                       w2_ref, b2_ref,   # encoder layer 2: 128 -> 64
                       w3_ref, b3_ref,   # decoder layer 1: 64 -> 128
                       w4_ref, b4_ref,   # decoder layer 2: 128 -> 768(pad)
                       dec_ref, enc_ref):
    x = x_ref[...]                                             # (TB, 768)

    # ---- encoder ----
    h1 = jnp.dot(x, w1_ref[...], preferred_element_type=jnp.float32) + b1_ref[...]
    h1 = jnp.maximum(h1, 0.0)                                  # ReLU
    enc = jnp.dot(h1, w2_ref[...], preferred_element_type=jnp.float32) + b2_ref[...]

    # ---- decoder ----
    h2 = jnp.dot(enc, w3_ref[...], preferred_element_type=jnp.float32) + b3_ref[...]
    h2 = jnp.maximum(h2, 0.0)                                  # ReLU
    dec = jnp.dot(h2, w4_ref[...], preferred_element_type=jnp.float32) + b4_ref[...]

    enc_ref[...] = enc.astype(enc_ref.dtype)
    dec_ref[...] = dec.astype(dec_ref.dtype)


def autoencoder_forward(x, params, *, tb=512):
    """x: (B, 720) f32. params: dict of pre-transposed (in, out) weights + (1, out) biases.

    Returns (decoded (B, 720), encoded (B, 64))."""
    B = x.shape[0]
    w1, b1, w2, b2, w3, b3, w4, b4 = (
        params["w1"], params["b1"], params["w2"], params["b2"],
        params["w3"], params["b3"], params["w4"], params["b4"],
    )

    # --- lane-dense feature padding: 720 -> 768 (zero rows/cols, exact math) ---
    x_p = jnp.pad(x, ((0, 0), (0, IN_PAD - IN_DIM)))                 # (B, 768)
    w1_p = jnp.pad(w1, ((0, IN_PAD - IN_DIM), (0, 0)))               # (768, 128)
    w4_p = jnp.pad(w4, ((0, 0), (0, IN_PAD - IN_DIM)))               # (128, 768)
    b4_p = jnp.pad(b4, ((0, 0), (0, IN_PAD - IN_DIM)))               # (1, 768)

    # --- batch tiling: TB rows per grid step (multiple of 8 sublanes) ---
    TB = min(tb, max(8, ((B + 7) // 8) * 8))
    n_tiles = pl.cdiv(B, TB)
    Bp = n_tiles * TB
    if Bp != B:
        x_p = jnp.pad(x_p, ((0, Bp - B), (0, 0)))

    # Per-step VMEM working set (TB=512): x 1.5 MiB + dec 1.5 MiB + enc 0.13 MiB
    # (x2 for double buffering) + ~0.9 MiB resident weights  ->  well under 32 MiB.
    tile_spec = lambda shape: pl.BlockSpec(shape, lambda i: (0, 0))   # resident weights/biases

    dec, enc = pl.pallas_call(
        autoencoder_kernel,
        out_shape=(
            jax.ShapeDtypeStruct((Bp, IN_PAD), jnp.float32),          # decoded (padded)
            jax.ShapeDtypeStruct((Bp, LATENT), jnp.float32),          # encoded
        ),
        grid=(n_tiles,),
        in_specs=[
            pl.BlockSpec((TB, IN_PAD), lambda i: (i, 0)),             # x tile
            tile_spec(w1_p.shape), tile_spec(b1.shape),
            tile_spec(w2.shape),   tile_spec(b2.shape),
            tile_spec(w3.shape),   tile_spec(b3.shape),
            tile_spec(w4_p.shape), tile_spec(b4_p.shape),
        ],
        out_specs=(
            pl.BlockSpec((TB, IN_PAD), lambda i: (i, 0)),             # dec tile
            pl.BlockSpec((TB, LATENT), lambda i: (i, 0)),             # enc tile
        ),
        compiler_params=pltpu.CompilerParams(
            dimension_semantics=("parallel",),                        # v7x megacore; no-op on v5e/v6e
            vmem_limit_bytes=32 * 1024 * 1024,
        ),
    )(x_p, w1_p, b1, w2, b2, w3, b3, w4_p, b4_p)

    return dec[:B, :IN_DIM], enc[:B, :]


def init_params(key):
    """Deterministic init mimicking PyTorch nn.Linear default:
    U(-1/sqrt(fan_in), 1/sqrt(fan_in)) for both weight and bias.
    Weights are stored as (in_features, out_features)."""
    def linear(key, fan_in, fan_out):
        kw, kb = jax.random.split(key)
        bound = 1.0 / jnp.sqrt(fan_in)
        w = jax.random.uniform(kw, (fan_in, fan_out), jnp.float32, -bound, bound)
        b = jax.random.uniform(kb, (1, fan_out), jnp.float32, -bound, bound)
        return w, b

    k1, k2, k3, k4 = jax.random.split(key, 4)
    w1, b1 = linear(k1, IN_DIM, H_DIM)
    w2, b2 = linear(k2, H_DIM, LATENT)
    w3, b3 = linear(k3, LATENT, H_DIM)
    w4, b4 = linear(k4, H_DIM, IN_DIM)
    return dict(w1=w1, b1=b1, w2=w2, b2=b2, w3=w3, b3=b3, w4=w4, b4=b4)


def reference_forward(x, p):
    h1 = jnp.maximum(x @ p["w1"] + p["b1"], 0.0)
    enc = h1 @ p["w2"] + p["b2"]
    h2 = jnp.maximum(enc @ p["w3"] + p["b3"], 0.0)
    dec = h2 @ p["w4"] + p["b4"]
    return dec, enc


if __name__ == "__main__":
    key = jax.random.PRNGKey(0)
    kx, kp, kx2 = jax.random.split(key, 3)
    params = init_params(kp)

    # --- primary small-shape run (batch=8) ---
    B = 8
    x = jax.random.normal(kx, (B, IN_DIM), dtype=jnp.float32)
    dec, enc = autoencoder_forward(x, params)
    dec, enc = jax.block_until_ready((dec, enc))

    dec_ref, enc_ref = reference_forward(x, params)
    assert dec.shape == (B, IN_DIM) and enc.shape == (B, LATENT)
    assert jnp.allclose(dec, dec_ref, atol=1e-4, rtol=1e-4)
    assert jnp.allclose(enc, enc_ref, atol=1e-4, rtol=1e-4)

    # --- exercise the tiled / padded path (batch not a multiple of the tile) ---
    B2 = 50
    x2 = jax.random.normal(kx2, (B2, IN_DIM), dtype=jnp.float32)
    dec2, enc2 = autoencoder_forward(x2, params, tb=16)
    dec2, enc2 = jax.block_until_ready((dec2, enc2))
    dec2_ref, enc2_ref = reference_forward(x2, params)
    assert dec2.shape == (B2, IN_DIM) and enc2.shape == (B2, LATENT)
    assert jnp.allclose(dec2, dec2_ref, atol=1e-4, rtol=1e-4)
    assert jnp.allclose(enc2, enc2_ref, atol=1e-4, rtol=1e-4)

    print("KERNEL_OK")
</pallas_src>

<mosaic_0001>
module attributes {stable_mosaic.version = 11 : i64} {
  func.func @autoencoder_kernel(%arg0: i32, %arg1: memref<8x768xf32, #tpu.memory_space<vmem>>, %arg2: memref<768x128xf32, #tpu.memory_space<vmem>>, %arg3: memref<1x128xf32, #tpu.memory_space<vmem>>, %arg4: memref<128x64xf32, #tpu.memory_space<vmem>>, %arg5: memref<1x64xf32, #tpu.memory_space<vmem>>, %arg6: memref<64x128xf32, #tpu.memory_space<vmem>>, %arg7: memref<1x128xf32, #tpu.memory_space<vmem>>, %arg8: memref<128x768xf32, #tpu.memory_space<vmem>>, %arg9: memref<1x768xf32, #tpu.memory_space<vmem>>, %arg10: memref<8x768xf32, #tpu.memory_space<vmem>>, %arg11: memref<8x64xf32, #tpu.memory_space<vmem>>) attributes {dimension_semantics = [#tpu.dimension_semantics<parallel>], iteration_bounds = array<i64: 1>, scalar_prefetch = 0 : i64, scratch_operands = 0 : i64, tpu.core_type = #tpu.core_type<tc>, window_params = [{transform_indices = @transform_0, window_bounds = array<i64: 8, 768>}, {pipeline_mode = #tpu.pipeline_mode<synchronous>, transform_indices = @transform_1, window_bounds = array<i64: 768, 128>}, {pipeline_mode = #tpu.pipeline_mode<synchronous>, transform_indices = @transform_2, window_bounds = array<i64: 1, 128>}, {pipeline_mode = #tpu.pipeline_mode<synchronous>, transform_indices = @transform_3, window_bounds = array<i64: 128, 64>}, {pipeline_mode = #tpu.pipeline_mode<synchronous>, transform_indices = @transform_4, window_bounds = array<i64: 1, 64>}, {pipeline_mode = #tpu.pipeline_mode<synchronous>, transform_indices = @transform_5, window_bounds = array<i64: 64, 128>}, {pipeline_mode = #tpu.pipeline_mode<synchronous>, transform_indices = @transform_6, window_bounds = array<i64: 1, 128>}, {pipeline_mode = #tpu.pipeline_mode<synchronous>, transform_indices = @transform_7, window_bounds = array<i64: 128, 768>}, {pipeline_mode = #tpu.pipeline_mode<synchronous>, transform_indices = @transform_8, window_bounds = array<i64: 1, 768>}, {transform_indices = @transform_9, window_bounds = array<i64: 8, 768>}, {transform_indices = @transform_10, window_bounds = array<i64: 8, 64>}]} {
    %c0 = arith.constant 0 : index
    %c0_0 = arith.constant 0 : index
    %0 = vector.load %arg1[%c0, %c0_0] : memref<8x768xf32, #tpu.memory_space<vmem>>, vector<8x768xf32>
    %c0_1 = arith.constant 0 : index
    %c0_2 = arith.constant 0 : index
    %1 = vector.load %arg2[%c0_1, %c0_2] : memref<768x128xf32, #tpu.memory_space<vmem>>, vector<768x128xf32>
    %cst = arith.constant dense<0.000000e+00> : vector<8x128xf32>
    %2 = tpu.matmul %0, %1, %cst {dimension_numbers = #tpu.dot_dimension_numbers<[1], [0], [0], [1], [0, 0, 1, 1], [], []>} : vector<8x768xf32>, vector<768x128xf32>, vector<8x128xf32> -> vector<8x128xf32>
    %c0_3 = arith.constant 0 : index
    %c0_4 = arith.constant 0 : index
    %3 = vector.load %arg3[%c0_3, %c0_4] : memref<1x128xf32, #tpu.memory_space<vmem>>, vector<1x128xf32>
    %4 = vector.broadcast %3 : vector<1x128xf32> to vector<8x128xf32>
    %5 = arith.addf %2, %4 : vector<8x128xf32>
    %cst_5 = arith.constant 0.000000e+00 : f32
    %6 = vector.broadcast %cst_5 : f32 to vector<8x128xf32>
    %7 = arith.maximumf %5, %6 : vector<8x128xf32>
    %c0_6 = arith.constant 0 : index
    %c0_7 = arith.constant 0 : index
    %8 = vector.load %arg4[%c0_6, %c0_7] : memref<128x64xf32, #tpu.memory_space<vmem>>, vector<128x64xf32>
    %cst_8 = arith.constant dense<0.000000e+00> : vector<8x64xf32>
    %9 = tpu.matmul %7, %8, %cst_8 {dimension_numbers = #tpu.dot_dimension_numbers<[1], [0], [0], [1], [0, 0, 1, 1], [], []>} : vector<8x128xf32>, vector<128x64xf32>, vector<8x64xf32> -> vector<8x64xf32>
    %c0_9 = arith.constant 0 : index
    %c0_10 = arith.constant 0 : index
    %10 = vector.load %arg5[%c0_9, %c0_10] : memref<1x64xf32, #tpu.memory_space<vmem>>, vector<1x64xf32>
    %11 = vector.broadcast %10 : vector<1x64xf32> to vector<8x64xf32>
    %12 = arith.addf %9, %11 : vector<8x64xf32>
    %c0_11 = arith.constant 0 : index
    %c0_12 = arith.constant 0 : index
    %13 = vector.load %arg6[%c0_11, %c0_12] : memref<64x128xf32, #tpu.memory_space<vmem>>, vector<64x128xf32>
    %cst_13 = arith.constant dense<0.000000e+00> : vector<8x128xf32>
    %14 = tpu.matmul %12, %13, %cst_13 {dimension_numbers = #tpu.dot_dimension_numbers<[1], [0], [0], [1], [0, 0, 1, 1], [], []>} : vector<8x64xf32>, vector<64x128xf32>, vector<8x128xf32> -> vector<8x128xf32>
    %c0_14 = arith.constant 0 : index
    %c0_15 = arith.constant 0 : index
    %15 = vector.load %arg7[%c0_14, %c0_15] : memref<1x128xf32, #tpu.memory_space<vmem>>, vector<1x128xf32>
    %16 = vector.broadcast %15 : vector<1x128xf32> to vector<8x128xf32>
    %17 = arith.addf %14, %16 : vector<8x128xf32>
    %cst_16 = arith.constant 0.000000e+00 : f32
    %18 = vector.broadcast %cst_16 : f32 to vector<8x128xf32>
    %19 = arith.maximumf %17, %18 : vector<8x128xf32>
    %c0_17 = arith.constant 0 : index
    %c0_18 = arith.constant 0 : index
    %20 = vector.load %arg8[%c0_17, %c0_18] : memref<128x768xf32, #tpu.memory_space<vmem>>, vector<128x768xf32>
    %cst_19 = arith.constant dense<0.000000e+00> : vector<8x768xf32>
    %21 = tpu.matmul %19, %20, %cst_19 {dimension_numbers = #tpu.dot_dimension_numbers<[1], [0], [0], [1], [0, 0, 1, 1], [], []>} : vector<8x128xf32>, vector<128x768xf32>, vector<8x768xf32> -> vector<8x768xf32>
    %c0_20 = arith.constant 0 : index
    %c0_21 = arith.constant 0 : index
    %22 = vector.load %arg9[%c0_20, %c0_21] : memref<1x768xf32, #tpu.memory_space<vmem>>, vector<1x768xf32>
    %23 = vector.broadcast %22 : vector<1x768xf32> to vector<8x768xf32>
    %24 = arith.addf %21, %23 : vector<8x768xf32>
    %c0_22 = arith.constant 0 : index
    %c0_23 = arith.constant 0 : index
    %25 = vector.load %arg11[%c0_22, %c0_23] : memref<8x64xf32, #tpu.memory_space<vmem>>, vector<8x64xf32>
    tpu.vector_store %arg11[%c0_22, %c0_23], %12 {strides = array<i32>} : memref<8x64xf32, #tpu.memory_space<vmem>>, vector<8x64xf32>,
    %c0_24 = arith.constant 0 : index
    %c0_25 = arith.constant 0 : index
    %26 = vector.load %arg10[%c0_24, %c0_25] : memref<8x768xf32, #tpu.memory_space<vmem>>, vector<8x768xf32>
    tpu.vector_store %arg10[%c0_24, %c0_25], %24 {strides = array<i32>} : memref<8x768xf32, #tpu.memory_space<vmem>>, vector<8x768xf32>,
    return
  }
  func.func @transform_0(%arg0: i32) -> (i32, i32) {
    %c0_i32 = arith.constant 0 : i32
    %c0_i32_0 = arith.constant 0 : i32
    return %arg0, %c0_i32 : i32, i32
  }
  func.func @transform_1(%arg0: i32) -> (i32, i32) {
    %c0_i32 = arith.constant 0 : i32
    %c0_i32_0 = arith.constant 0 : i32
    %c0_i32_1 = arith.constant 0 : i32
    return %c0_i32, %c0_i32_0 : i32, i32
  }
  func.func @transform_2(%arg0: i32) -> (i32, i32) {
    %c0_i32 = arith.constant 0 : i32
    %c0_i32_0 = arith.constant 0 : i32
    %c0_i32_1 = arith.constant 0 : i32
    return %c0_i32, %c0_i32_0 : i32, i32
  }
  func.func @transform_3(%arg0: i32) -> (i32, i32) {
    %c0_i32 = arith.constant 0 : i32
    %c0_i32_0 = arith.constant 0 : i32
    %c0_i32_1 = arith.constant 0 : i32
    return %c0_i32, %c0_i32_0 : i32, i32
  }
  func.func @transform_4(%arg0: i32) -> (i32, i32) {
    %c0_i32 = arith.constant 0 : i32
    %c0_i32_0 = arith.constant 0 : i32
    %c0_i32_1 = arith.constant 0 : i32
    return %c0_i32, %c0_i32_0 : i32, i32
  }
  func.func @transform_5(%arg0: i32) -> (i32, i32) {
    %c0_i32 = arith.constant 0 : i32
    %c0_i32_0 = arith.constant 0 : i32
    %c0_i32_1 = arith.constant 0 : i32
    return %c0_i32, %c0_i32_0 : i32, i32
  }
  func.func @transform_6(%arg0: i32) -> (i32, i32) {
    %c0_i32 = arith.constant 0 : i32
    %c0_i32_0 = arith.constant 0 : i32
    %c0_i32_1 = arith.constant 0 : i32
    return %c0_i32, %c0_i32_0 : i32, i32
  }
  func.func @transform_7(%arg0: i32) -> (i32, i32) {
    %c0_i32 = arith.constant 0 : i32
    %c0_i32_0 = arith.constant 0 : i32
    %c0_i32_1 = arith.constant 0 : i32
    return %c0_i32, %c0_i32_0 : i32, i32
  }
  func.func @transform_8(%arg0: i32) -> (i32, i32) {
    %c0_i32 = arith.constant 0 : i32
    %c0_i32_0 = arith.constant 0 : i32
    %c0_i32_1 = arith.constant 0 : i32
    return %c0_i32, %c0_i32_0 : i32, i32
  }
  func.func @transform_9(%arg0: i32) -> (i32, i32) {
    %c0_i32 = arith.constant 0 : i32
    %c0_i32_0 = arith.constant 0 : i32
    return %arg0, %c0_i32 : i32, i32
  }
  func.func @transform_10(%arg0: i32) -> (i32, i32) {
    %c0_i32 = arith.constant 0 : i32
    %c0_i32_0 = arith.constant 0 : i32
    return %arg0, %c0_i32 : i32, i32
  }
}

</mosaic_0001>

<bundles_post_ra>
// kernel: tpu_custom_call.1
= control target key start
LH: loop header
LB: loop body
LE: loop exit
PB: predicated region body
PF: predicated region fallthrough
CT: control target
= control target key end

     0   :  { %16 = vsyncpa [#allocation3], 0  ;;  %s1690_s0 = inlined_call_operand.vmem [shape: f32[8,768], index: 0, kind: input, shape index: {}]   ;;  %s1691_s1 = inlined_call_operand.hbm [shape: f32[768,128], index: 1, kind: input, shape index: {}]   ;;  %s1692_s2 = inlined_call_operand.vmem [shape: f32[1,128], index: 2, kind: input, shape index: {}]   ;;  %s1693_s3 = inlined_call_operand.vmem [shape: f32[128,64], index: 3, kind: input, shape index: {}]   ;;  %s1694_s4 = inlined_call_operand.vmem [shape: f32[1,64], index: 4, kind: input, shape index: {}]   ;;  %s1695_s5 = inlined_call_operand.vmem [shape: f32[64,128], index: 5, kind: input, shape index: {}]   ;;  %s1696_s6 = inlined_call_operand.vmem [shape: f32[1,128], index: 6, kind: input, shape index: {}]   ;;  %s1697_s7 = inlined_call_operand.hbm [shape: f32[128,768], index: 7, kind: input, shape index: {}]   ;;  %s1698_s8 = inlined_call_operand.vmem [shape: f32[1,768], index: 8, kind: input, shape index: {}]   ;;  %s1699_s9 = inlined_call_operand.hbm [shape: f32[8,768], index: 9, kind: output, shape index: {0}]   ;;  %s1700_s10 = inlined_call_operand.hbm [shape: f32[8,64], index: 10, kind: output, shape index: {1}]  }
   0x1   :  { %17 = vsyncpa [#allocation6], 0 }
   0x2   :  { %18 = vsyncpa [#allocation4], 0 }
   0x3   :  { %19 = vsyncpa [#allocation9], 0  ;;  %s1469_s13 = smov [#allocation2]   ;;  %s1373_s17 = scalar_lea.hbm %s1691_s1, 12288 }
   0x4   :  { %s27_s14 = sshll.u32 %s1469_s13, 4  ;;  %p1374_p0 = scmp.ne.s32.totalorder %s1691_s1, %s1373_s17  ;;  %s28_s14 = int_to_ptr.vmem [resolvable:$true] %s27_s14 }
   0x5   :  { %p1377_p1 = scmp.lt.u32.totalorder %s1373_s17, %s1691_s1 }
   0x7   :  { %p1379_p2 = pnand %p1377_p1, %p1374_p0 }
   0x9   :  { %1382 = shalt.err (!%p1379_p2)
}
   0xa   :  { %s1383_s22 = scalar_lea.vmem %s28_s14, 12288  ;;  %p1388_p4 = scmp.lt.s32.totalorder %s28_s14, %s28_s14 }
   0xb   :  { %p1384_p3 = scmp.ne.s32.totalorder %s28_s14, %s1383_s22  ;;  %p1389_p5 = scmp.lt.s32.totalorder %s1383_s22, %s1383_s22 }
   0xd   :  { %p1390_p6 = por %p1389_p5, %p1388_p4 }
   0xf   :  { %p1391_p7 = pnand %p1390_p6, %p1384_p3 }
  0x11   :  { %1394 = shalt.err (!%p1391_p7)
}
  0x12   :  { %s1470_s23 = smov 128   ;;  %s1471_s24 = smov 8  }
  0x13   :  { %33 = dma.hbm_to_vmem [thread:$0]  %s1691_s1, 12288, %s28_s14, [#allocation3], %s1470_s23, %s1470_s23, %s1471_s24  }
  0x14   :  { %s1472_s27 = smov [#allocation5]   ;;  %s1395_s11 = scalar_lea.hbm %s1697_s7, 12288 }
  0x15   :  { %s49_s28 = sshll.u32 %s1472_s27, 4  ;;  %p1396_p8 = scmp.ne.s32.totalorder %s1697_s7, %s1395_s11  ;;  %s50_s28 = int_to_ptr.vmem [resolvable:$true] %s49_s28 }
  0x16   :  { %p1399_p9 = scmp.lt.u32.totalorder %s1395_s11, %s1697_s7 }
  0x18   :  { %p1401_p10 = pnand %p1399_p9, %p1396_p8 }
  0x1a   :  { %1404 = shalt.err (!%p1401_p10)
}
  0x1b   :  { %s1405_s17 = scalar_lea.vmem %s50_s28, 12288  ;;  %p1410_p12 = scmp.lt.s32.totalorder %s50_s28, %s50_s28 }
  0x1c   :  { %p1406_p11 = scmp.ne.s32.totalorder %s50_s28, %s1405_s17  ;;  %p1411_p13 = scmp.lt.s32.totalorder %s1405_s17, %s1405_s17 }
  0x1e   :  { %p1412_p0 = por %p1411_p13, %p1410_p12 }
  0x20   :  { %p1413_p1 = pnand %p1412_p0, %p1406_p11 }
  0x22   :  { %1416 = shalt.err (!%p1413_p1)
}
  0x23   :  { %s1473_s1 = smov 768   ;;  %s1474_s14 = smov 48  }
  0x24   :  { %55 = dma.hbm_to_vmem [thread:$0]  %s1697_s7, 12288, %s50_s28, [#allocation6], %s1473_s1, %s1473_s1, %s1474_s14  }
  0x25   :  { %1461 = dma.done.wait [#allocation3], 12288  }
  0x26   :  { %1462 = vsyncadd [#allocation3], 4294955008 }
  0x27   :  { %1463 = dma.done.wait [#allocation6], 12288  }
  0x28   :  { %1464 = vsyncadd [#allocation6], 4294955008  ;;  %v86_v0 = vld [vmem:[#allocation2 + $0x80] sm:$0xff]  ;;  %v87_v1 = vld [vmem:[#allocation2 + $0x88] sm:$0xff]  ;;  %vm1476_vm0 = vmmov 0   ;;  %vm492_vm1 = vcmask 523264  }
  0x29   :  { %v70_v2 = vld [vmem:[#allocation2] sm:$0xff]  ;;  %v1134_v3 = vpack.c.bf16 %v87_v1, %v86_v0  ;;  %v71_v4 = vld [vmem:[#allocation2 + $0x8] sm:$0xff]  ;;  %v88_v11 = vld [vmem:[#allocation2 + $0x90] sm:$0xff] }
  0x2a   :  { %v118_v5 = vld [vmem:[#allocation2 + $0x180] sm:$0xff]  ;;  %v119_v6 = vld [vmem:[#allocation2 + $0x188] sm:$0xff]  ;;  %v1136_v7 = vpack.c.bf16 %v71_v4, %v70_v2  ;;  %v89_v13 = vld [vmem:[#allocation2 + $0x98] sm:$0xff] }
  0x2b   :  { %v1166_v8 = vpack.c.bf16 %v119_v6, %v118_v5  ;;  %v102_v9 = vld [vmem:[#allocation2 + $0x100] sm:$0xff]  ;;  %v103_v10 = vld [vmem:[#allocation2 + $0x108] sm:$0xff]  ;;  %1135 = vmatprep.subr.bf16.mxu0 %v1134_v3  ;;  %v72_v14 = vld [vmem:[#allocation2 + $0x10] sm:$0xff]  ;;  %v1138_v16 = vpack.c.bf16 %v89_v13, %v88_v11 }
  0x2c   :  { %v1168_v12 = vpack.c.bf16 %v103_v10, %v102_v9  ;;  %v73_v15 = vld [vmem:[#allocation2 + $0x18] sm:$0xff]  ;;  %1137 = vmatpush3.bf16.msra.mxu0 %v1136_v7  ;;  %v120_v18 = vld [vmem:[#allocation2 + $0x190] sm:$0xff]  ;;  %v90_v23 = vld [vmem:[#allocation2 + $0xa0] sm:$0xff] }
  0x2d   :  { %1167 = vmatprep.subr.bf16.mxu1 %v1166_v8  ;;  %v1140_v17 = vpack.c.bf16 %v73_v15, %v72_v14  ;;  %v121_v19 = vld [vmem:[#allocation2 + $0x198] sm:$0xff]  ;;  %v104_v20 = vld [vmem:[#allocation2 + $0x110] sm:$0xff]  ;;  %v91_v24 = vld [vmem:[#allocation2 + $0xa8] sm:$0xff]  ;;  %1139 = vmatprep.subr.bf16.mxu0 %v1138_v16 }
  0x2e   :  { %1169 = vmatpush3.bf16.msra.mxu1 %v1168_v12  ;;  %v1170_v21 = vpack.c.bf16 %v121_v19, %v120_v18  ;;  %v105_v22 = vld [vmem:[#allocation2 + $0x118] sm:$0xff]  ;;  %v1142_v26 = vpack.c.bf16 %v91_v24, %v90_v23  ;;  %v74_v27 = vld [vmem:[#allocation2 + $0x20] sm:$0xff]  ;;  %v75_v28 = vld [vmem:[#allocation2 + $0x28] sm:$0xff] }
  0x2f   :  { %v1172_v25 = vpack.c.bf16 %v105_v22, %v104_v20  ;;  %v122_v29 = vld [vmem:[#allocation2 + $0x1a0] sm:$0xff]  ;;  %v123_v30 = vld [vmem:[#allocation2 + $0x1a8] sm:$0xff]  ;;  %v1144_v33 = vpack.c.bf16 %v75_v28, %v74_v27  ;;  %v92_v35 = vld [vmem:[#allocation2 + $0xb0] sm:$0xff] }
  0x30   :  { %1171 = vmatprep.subr.bf16.mxu1 %v1170_v21  ;;  %v106_v31 = vld [vmem:[#allocation2 + $0x120] sm:$0xff]  ;;  %v107_v32 = vld [vmem:[#allocation2 + $0x128] sm:$0xff]  ;;  %1141 = vmatpush3.bf16.msra.mxu0 %v1140_v17  ;;  %v1174_v34 = vpack.c.bf16 %v123_v30, %v122_v29  ;;  %v93_v36 = vld [vmem:[#allocation2 + $0xb8] sm:$0xff] }
  0x31   :  { %v76_v37 = vld [vmem:[#allocation2 + $0x30] sm:$0xff]  ;;  %1143 = vmatprep.subr.bf16.mxu0 %v1142_v26  ;;  %v1176_v38 = vpack.c.bf16 %v107_v32, %v106_v31  ;;  %v1146_v39 = vpack.c.bf16 %v93_v36, %v92_v35  ;;  %v77_v40 = vld [vmem:[#allocation2 + $0x38] sm:$0xff]  ;;  %v94_v46 = vld [vmem:[#allocation2 + $0xc0] sm:$0xff] }
  0x32   :  { %1173 = vmatpush3.bf16.msra.mxu1 %v1172_v25  ;;  %v124_v41 = vld [vmem:[#allocation2 + $0x1b0] sm:$0xff]  ;;  %v125_v42 = vld [vmem:[#allocation2 + $0x1b8] sm:$0xff]  ;;  %v95_v47 = vld [vmem:[#allocation2 + $0xc8] sm:$0xff]  ;;  %v1148_v48 = vpack.c.bf16 %v77_v40, %v76_v37 }
  0x33   :  { %1175 = vmatprep.subr.bf16.mxu1 %v1174_v34  ;;  %v1178_v43 = vpack.c.bf16 %v125_v42, %v124_v41  ;;  %v108_v44 = vld [vmem:[#allocation2 + $0x130] sm:$0xff]  ;;  %v109_v45 = vld [vmem:[#allocation2 + $0x138] sm:$0xff]  ;;  %v126_v49 = vld [vmem:[#allocation2 + $0x1c0] sm:$0xff]  ;;  %v1150_v52 = vpack.c.bf16 %v95_v47, %v94_v46 }
  0x34   :  { %1145 = vmatpush3.bf16.msra.mxu0 %v1144_v33  ;;  %v127_v50 = vld [vmem:[#allocation2 + $0x1c8] sm:$0xff]  ;;  %v1180_v51 = vpack.c.bf16 %v109_v45, %v108_v44  ;;  %v78_v53 = vld [vmem:[#allocation2 + $0x40] sm:$0xff]  ;;  %v96_v58 = vld [vmem:[#allocation2 + $0xd0] sm:$0xff] }
  0x35   :  { %1147 = vmatprep.subr.bf16.mxu0 %v1146_v39  ;;  %v79_v54 = vld [vmem:[#allocation2 + $0x48] sm:$0xff]  ;;  %v110_v55 = vld [vmem:[#allocation2 + $0x140] sm:$0xff]  ;;  %v1182_v56 = vpack.c.bf16 %v127_v50, %v126_v49  ;;  %v97_v59 = vld [vmem:[#allocation2 + $0xd8] sm:$0xff] }
  0x36   :  { %1177 = vmatpush3.bf16.msra.mxu1 %v1176_v38  ;;  %v111_v57 = vld [vmem:[#allocation2 + $0x148] sm:$0xff]  ;;  %v128_v60 = vld [vmem:[#allocation2 + $0x1d0] sm:$0xff]  ;;  %v129_v61 = vld [vmem:[#allocation2 + $0x1d8] sm:$0xff]  ;;  %v1152_v62 = vpack.c.bf16 %v79_v54, %v78_v53  ;;  %v1154_v0 = vpack.c.bf16 %v97_v59, %v96_v58 }
  0x37   :  { %1179 = vmatprep.subr.bf16.mxu1 %v1178_v43  ;;  %v1184_v63 = vpack.c.bf16 %v111_v57, %v110_v55  ;;  %v80_v1 = vld [vmem:[#allocation2 + $0x50] sm:$0xff]  ;;  %v81_v2 = vld [vmem:[#allocation2 + $0x58] sm:$0xff]  ;;  %v1186_v4 = vpack.c.bf16 %v129_v61, %v128_v60  ;;  %v98_v6 = vld [vmem:[#allocation2 + $0xe0] sm:$0xff] }
  0x38   :  { %1149 = vmatpush3.bf16.msra.mxu0 %v1148_v48  ;;  %v112_v3 = vld [vmem:[#allocation2 + $0x150] sm:$0xff]  ;;  %v113_v5 = vld [vmem:[#allocation2 + $0x158] sm:$0xff]  ;;  %v99_v7 = vld [vmem:[#allocation2 + $0xe8] sm:$0xff]  ;;  %v1156_v10 = vpack.c.bf16 %v81_v2, %v80_v1 }
  0x39   :  { %1151 = vmatprep.subr.bf16.mxu0 %v1150_v52  ;;  %v130_v8 = vld [vmem:[#allocation2 + $0x1e0] sm:$0xff]  ;;  %v131_v9 = vld [vmem:[#allocation2 + $0x1e8] sm:$0xff]  ;;  %v1188_v13 = vpack.c.bf16 %v113_v5, %v112_v3  ;;  %v1158_v14 = vpack.c.bf16 %v99_v7, %v98_v6  ;;  %v100_v19 = vld [vmem:[#allocation2 + $0xf0] sm:$0xff] }
  0x3a   :  { %1181 = vmatpush3.bf16.msra.mxu1 %v1180_v51  ;;  %v82_v11 = vld [vmem:[#allocation2 + $0x60] sm:$0xff]  ;;  %v65_v12 = vld [vmem:[%s1690_s0 + $0x8] sm:$0xff]  ;;  %v1190_v18 = vpack.c.bf16 %v131_v9, %v130_v8  ;;  %v101_v20 = vld [vmem:[#allocation2 + $0xf8] sm:$0xff] }
  0x3b   :  { %1183 = vmatprep.subr.bf16.mxu1 %v1182_v56  ;;  %v83_v15 = vld [vmem:[#allocation2 + $0x68] sm:$0xff]  ;;  %v114_v16 = vld [vmem:[#allocation2 + $0x160] sm:$0xff]  ;;  %237 = vmatprep.mubr.f32.mxu0 %v65_v12  ;;  %v67_v21 = vld [vmem:[%s1690_s0 + $0x18] sm:$0xff]  ;;  %v1162_v26 = vpack.c.bf16 %v101_v20, %v100_v19 }
  0x3c   :  { %1153 = vmatpush3.bf16.msra.mxu0 %v1152_v62  ;;  %v115_v17 = vld [vmem:[#allocation2 + $0x168] sm:$0xff]  ;;  %v132_v22 = vld [vmem:[#allocation2 + $0x1f0] sm:$0xff]  ;;  %v133_v23 = vld [vmem:[#allocation2 + $0x1f8] sm:$0xff]  ;;  %307 = vmatprep.mubr.f32.mxu1 %v67_v21  ;;  %v1160_v24 = vpack.c.bf16 %v83_v15, %v82_v11 }
  0x3d   :  { %1155 = vmatprep.subr.bf16.mxu0 %v1154_v0  ;;  %v1192_v25 = vpack.c.bf16 %v115_v17, %v114_v16  ;;  %v84_v27 = vld [vmem:[#allocation2 + $0x70] sm:$0xff]  ;;  %v85_v28 = vld [vmem:[#allocation2 + $0x78] sm:$0xff]  ;;  %v1194_v30 = vpack.c.bf16 %v133_v23, %v132_v22  ;;  %v150_v32 = vld [vmem:[#allocation2 + $0x280] sm:$0xff] }
  0x3e   :  { %1185 = vmatpush3.bf16.msra.mxu1 %v1184_v63  ;;  %v116_v29 = vld [vmem:[#allocation2 + $0x170] sm:$0xff]  ;;  %v117_v31 = vld [vmem:[#allocation2 + $0x178] sm:$0xff]  ;;  %v151_v33 = vld [vmem:[#allocation2 + $0x288] sm:$0xff]  ;;  %v1164_v34 = vpack.c.bf16 %v85_v28, %v84_v27 }
  0x3f   :  { %1187 = vmatprep.subr.bf16.mxu1 %v1186_v4  ;;  %v1196_v35 = vpack.c.bf16 %v117_v31, %v116_v29  ;;  %v1198_v36 = vpack.c.bf16 %v151_v33, %v150_v32  ;;  %v134_v37 = vld [vmem:[#allocation2 + $0x200] sm:$0xff]  ;;  %v135_v38 = vld [vmem:[#allocation2 + $0x208] sm:$0xff]  ;;  %v152_v39 = vld [vmem:[#allocation2 + $0x290] sm:$0xff] }
  0x40   :  { %1157 = vmatpush3.bf16.msra.mxu0 %v1156_v10  ;;  %v153_v40 = vld [vmem:[#allocation2 + $0x298] sm:$0xff]  ;;  %v64_v41 = vld [vmem:[%s1690_s0] sm:$0xff]  ;;  %v1200_v42 = vpack.c.bf16 %v135_v38, %v134_v37  ;;  %v66_v43 = vld [vmem:[%s1690_s0 + $0x10] sm:$0xff] }
  0x41   :  { %1159 = vmatprep.subr.bf16.mxu0 %v1158_v14  ;;  %v1202_v44 = vpack.c.bf16 %v153_v40, %v152_v39  ;;  %v136_v45 = vld [vmem:[#allocation2 + $0x210] sm:$0xff]  ;;  %v137_v46 = vld [vmem:[#allocation2 + $0x218] sm:$0xff]  ;;  %v154_v47 = vld [vmem:[#allocation2 + $0x2a0] sm:$0xff] }
  0x42   :  { %1189 = vmatpush3.bf16.msra.mxu1 %v1188_v13  ;;  %v155_v48 = vld [vmem:[#allocation2 + $0x2a8] sm:$0xff]  ;;  %v1204_v50 = vpack.c.bf16 %v137_v46, %v136_v45  ;;  %v138_v52 = vld [vmem:[#allocation2 + $0x220] sm:$0xff]  ;;  %v156_v54 = vld [vmem:[#allocation2 + $0x2b0] sm:$0xff] }
  0x43   :  { %1191 = vmatprep.subr.bf16.mxu1 %v1190_v18  ;;  %v69_v49 = vld [vmem:[%s1690_s0 + $0x28] sm:$0xff]  ;;  %v1206_v51 = vpack.c.bf16 %v155_v48, %v154_v47  ;;  %v157_v55 = vld [vmem:[#allocation2 + $0x2b8] sm:$0xff]  ;;  %v140_v58 = vld [vmem:[#allocation2 + $0x230] sm:$0xff]  ;;  %v1477_v47 = vmov 0.0  }
  0x44   :  { %1161 = vmatpush3.bf16.msra.mxu0 %v1160_v24  ;;  %v139_v53 = vld [vmem:[#allocation2 + $0x228] sm:$0xff]  ;;  %v1210_v57 = vpack.c.bf16 %v157_v55, %v156_v54  ;;  %v141_v59 = vld [vmem:[#allocation2 + $0x238] sm:$0xff]  ;;  %v158_v60 = vld [vmem:[#allocation2 + $0x2c0] sm:$0xff] }
  0x45   :  { %1163 = vmatprep.subr.bf16.mxu0 %v1162_v26  ;;  %v1208_v56 = vpack.c.bf16 %v139_v53, %v138_v52  ;;  %v159_v61 = vld [vmem:[#allocation2 + $0x2c8] sm:$0xff]  ;;  %v1212_v62 = vpack.c.bf16 %v141_v59, %v140_v58  ;;  %v142_v0 = vld [vmem:[#allocation2 + $0x240] sm:$0xff]  ;;  %v160_v2 = vld [vmem:[#allocation2 + $0x2d0] sm:$0xff] }
  0x46   :  { %1193 = vmatpush3.bf16.msra.mxu1 %v1192_v25  ;;  %v1214_v63 = vpack.c.bf16 %v159_v61, %v158_v60  ;;  %v143_v1 = vld [vmem:[#allocation2 + $0x248] sm:$0xff]  ;;  %v161_v3 = vld [vmem:[#allocation2 + $0x2d8] sm:$0xff]  ;;  %v144_v6 = vld [vmem:[#allocation2 + $0x250] sm:$0xff]  ;;  %v1475_v25 = vmov 0.0|0.0  }
  0x47   :  { %1195 = vmatprep.subr.bf16.mxu1 %v1194_v30  ;;  %v1216_v4 = vpack.c.bf16 %v143_v1, %v142_v0  ;;  %v1218_v5 = vpack.c.bf16 %v161_v3, %v160_v2  ;;  %v145_v7 = vld [vmem:[#allocation2 + $0x258] sm:$0xff]  ;;  %v162_v8 = vld [vmem:[#allocation2 + $0x2e0] sm:$0xff]  ;;  %v163_v9 = vld [vmem:[#allocation2 + $0x2e8] sm:$0xff] }
  0x48   :  { %1165 = vmatpush3.bf16.msra.mxu0 %v1164_v34  ;;  %v1220_v10 = vpack.c.bf16 %v145_v7, %v144_v6  ;;  %v1222_v11 = vpack.c.bf16 %v163_v9, %v162_v8  ;;  %v146_v12 = vld [vmem:[#allocation2 + $0x260] sm:$0xff]  ;;  %v147_v13 = vld [vmem:[#allocation2 + $0x268] sm:$0xff]  ;;  %v164_v14 = vld [vmem:[#allocation2 + $0x2f0] sm:$0xff] }
  0x49   :  { %1199 = vmatprep.subr.bf16.mxu0 %v1198_v36  ;;  %v165_v15 = vld [vmem:[#allocation2 + $0x2f8] sm:$0xff]  ;;  %v1224_v16 = vpack.c.bf16 %v147_v13, %v146_v12  ;;  %v148_v18 = vld [vmem:[#allocation2 + $0x270] sm:$0xff]  ;;  %v68_v21 = vld [vmem:[%s1690_s0 + $0x20] sm:$0xff] }
  0x4a   :  { %1197 = vmatpush3.bf16.msra.mxu1 %v1196_v35  ;;  %v1226_v17 = vpack.c.bf16 %v165_v15, %v164_v14  ;;  %v149_v19 = vld [vmem:[#allocation2 + $0x278] sm:$0xff]  ;;  %v384_v22 = vld [vmem:[%s1693_s3] sm:$0xff]  ;;  %v385_v23 = vld [vmem:[%s1693_s3 + $0x8] sm:$0xff] }
  0x4b   :  { %238 = vmatmul.mubr.f32.vlgmr.msra.gmra.mrb[0].mxu0 %v64_v41  ;;  %v1228_v20 = vpack.c.bf16 %v149_v19, %v148_v18  ;;  %v386_v24 = vld [vmem:[%s1693_s3 + $0x10] sm:$0xff]  ;;  %1230 = vmatprep.subr.bf16.mxu1 %v1475_v25  ;;  %v1231_v26 = vpack.c.bf16 %v385_v23, %v384_v22  ;;  %v387_v27 = vld [vmem:[%s1693_s3 + $0x18] sm:$0xff]  ;;  %v388_v29 = vld [vmem:[%s1693_s3 + $0x20] sm:$0xff] }
  0x4c   :  { %1201 = vmatpush3.bf16.msra.mxu0 %v1200_v42  ;;  %377 = vmatprep.mubr.f32.mxu0 %v69_v49  ;;  %v1234_v28 = vpack.c.bf16 %v387_v27, %v386_v24  ;;  %v389_v30 = vld [vmem:[%s1693_s3 + $0x28] sm:$0xff]  ;;  %v390_v32 = vld [vmem:[%s1693_s3 + $0x30] sm:$0xff]  ;;  %v391_v33 = vld [vmem:[%s1693_s3 + $0x38] sm:$0xff] }
  0x4d   :  { %308 = vmatmul.mubr.f32.vlgmr.msra.gmra.mrb[0].mxu1 %v66_v43  ;;  %1203 = vmatprep.subr.bf16.mxu0 %v1202_v44  ;;  %v1237_v31 = vpack.c.bf16 %v389_v30, %v388_v29  ;;  %v1240_v34 = vpack.c.bf16 %v391_v33, %v390_v32  ;;  %v392_v35 = vld [vmem:[%s1693_s3 + $0x40] sm:$0xff]  ;;  %v393_v36 = vld [vmem:[%s1693_s3 + $0x48] sm:$0xff]  ;;  %v394_v38 = vld [vmem:[%s1693_s3 + $0x50] sm:$0xff] }
  0x4e   :  { %1232 = vmatpush3.bf16.msra.mxu1 %v1231_v26  ;;  %v1243_v37 = vpack.c.bf16 %v393_v36, %v392_v35  ;;  %v395_v39 = vld [vmem:[%s1693_s3 + $0x58] sm:$0xff]  ;;  %v396_v41 = vld [vmem:[%s1693_s3 + $0x60] sm:$0xff]  ;;  %v397_v42 = vld [vmem:[%s1693_s3 + $0x68] sm:$0xff]  ;;  %1112 = vmatprep.mubr.msk.f32.mxu1 %vm1476_vm0, %v1477_v47 }
  0x4f   :  { %1233 = vmatprep.subr.bf16.mxu1 %v1475_v25  ;;  %v1246_v40 = vpack.c.bf16 %v395_v39, %v394_v38  ;;  %v1249_v43 = vpack.c.bf16 %v397_v42, %v396_v41  ;;  %v398_v44 = vld [vmem:[%s1693_s3 + $0x70] sm:$0xff]  ;;  %v399_v45 = vld [vmem:[%s1693_s3 + $0x78] sm:$0xff]  ;;  %v477_v48 = vld [vmem:[%s1695_s5] sm:$0xff] }
  0x50   :  { %1205 = vmatpush3.bf16.msra.mxu0 %v1204_v50  ;;  %v1252_v46 = vpack.c.bf16 %v399_v45, %v398_v44  ;;  %v478_v49 = vld [vmem:[%s1695_s5 + $0x8] sm:$0xff]  ;;  %v479_v50 = vld [vmem:[%s1695_s5 + $0x10] sm:$0xff]  ;;  %v480_v52 = vld [vmem:[%s1695_s5 + $0x18] sm:$0xff] }
  0x51   :  { %1207 = vmatprep.subr.bf16.mxu0 %v1206_v51  ;;  %v1255_v51 = vpack.c.bf16 %v478_v49, %v477_v48  ;;  %v1258_v53 = vpack.c.bf16 %v480_v52, %v479_v50  ;;  %v481_v54 = vld [vmem:[%s1695_s5 + $0x20] sm:$0xff]  ;;  %v482_v55 = vld [vmem:[%s1695_s5 + $0x28] sm:$0xff]  ;;  %v483_v7 = vld [vmem:[%s1695_s5 + $0x30] sm:$0xff] }
  0x52   :  { %1235 = vmatpush3.bf16.msra.mxu1 %v1234_v28  ;;  %v945_v58 = vld [vmem:[%s1692_s2] ss:$0 sm:$0xff]  ;;  %v484_v8 = vld [vmem:[%s1695_s5 + $0x38] sm:$0xff]  ;;  %v573_v14 = vld [vmem:[#allocation5 + $0x30] sm:$0xff] }
  0x53   :  { %1236 = vmatprep.subr.bf16.mxu1 %v1475_v25  ;;  %v1264_v9 = vpack.c.bf16 %v484_v8, %v483_v7  ;;  %v567_v12 = vld [vmem:[#allocation5] sm:$0xff]  ;;  %v570_v15 = vld [vmem:[#allocation5 + $0x18] sm:$0xff]  ;;  %v580_v19 = vld [vmem:[#allocation5 + $0x68] sm:$0xff] }
  0x54   :  { %1209 = vmatpush3.bf16.msra.mxu0 %v1208_v56  ;;  %v1261_v56 = vpack.c.bf16 %v482_v55, %v481_v54  ;;  %v585_v22 = vld [vmem:[#allocation5 + $0x90] sm:$0xff]  ;;  %v598_v26 = vld [vmem:[#allocation5 + $0xf8] sm:$0xff]  ;;  %v591_v28 = vld [vmem:[#allocation5 + $0xc0] sm:$0xff] }
  0x55   :  { %1211 = vmatprep.subr.bf16.mxu0 %v1210_v57  ;;  %v597_v29 = vld [vmem:[#allocation5 + $0xf0] sm:$0xff]  ;;  %v610_v32 = vld [vmem:[#allocation5 + $0x158] sm:$0xff]  ;;  %v603_v33 = vld [vmem:[#allocation5 + $0x120] sm:$0xff] }
  0x56   :  { %1238 = vmatpush3.bf16.msra.mxu1 %v1237_v31  ;;  %v1276_v30 = vpack.c.bf16 %v597_v29, %v591_v28  ;;  %v604_v31 = vld [vmem:[#allocation5 + $0x128] sm:$0xff]  ;;  %v609_v35 = vld [vmem:[#allocation5 + $0x150] sm:$0xff]  ;;  %v622_v38 = vld [vmem:[#allocation5 + $0x1b8] sm:$0xff] }
  0x57   :  { %1239 = vmatprep.subr.bf16.mxu1 %v1475_v25  ;;  %v1280_v36 = vpack.c.bf16 %v609_v35, %v603_v33  ;;  %v615_v39 = vld [vmem:[#allocation5 + $0x180] sm:$0xff]  ;;  %v621_v41 = vld [vmem:[#allocation5 + $0x1b0] sm:$0xff]  ;;  %v634_v44 = vld [vmem:[#allocation5 + $0x218] sm:$0xff] }
  0x58   :  { %1213 = vmatpush3.bf16.msra.mxu0 %v1212_v62  ;;  %v1284_v42 = vpack.c.bf16 %v621_v41, %v615_v39  ;;  %v627_v45 = vld [vmem:[#allocation5 + $0x1e0] sm:$0xff]  ;;  %v633_v48 = vld [vmem:[#allocation5 + $0x210] sm:$0xff]  ;;  %v640_v50 = vld [vmem:[#allocation5 + $0x248] sm:$0xff] }
  0x59   :  { %1215 = vmatprep.subr.bf16.mxu0 %v1214_v63  ;;  %v1288_v49 = vpack.c.bf16 %v633_v48, %v627_v45  ;;  %v639_v52 = vld [vmem:[#allocation5 + $0x240] sm:$0xff]  ;;  %v645_v54 = vld [vmem:[#allocation5 + $0x270] sm:$0xff]  ;;  %v642_v28 = vld [vmem:[#allocation5 + $0x258] sm:$0xff] }
  0x5a   :  { %1241 = vmatpush3.bf16.msra.mxu1 %v1240_v34  ;;  %v1278_v34 = vpack.c.bf16 %v610_v32, %v604_v31  ;;  %v1292_v55 = vpack.c.bf16 %v645_v54, %v639_v52  ;;  %v593_v8 = vld [vmem:[#allocation5 + $0xd0] sm:$0xff]  ;;  %v648_v29 = vld [vmem:[#allocation5 + $0x288] sm:$0xff]  ;;  %v647_v33 = vld [vmem:[#allocation5 + $0x280] sm:$0xff] }
  0x5b   :  { %1242 = vmatprep.subr.bf16.mxu1 %v1475_v25  ;;  %v1322_v31 = vpack.c.bf16 %v648_v29, %v642_v28  ;;  %v641_v32 = vld [vmem:[#allocation5 + $0x250] sm:$0xff]  ;;  %v652_v35 = vld [vmem:[#allocation5 + $0x2a8] sm:$0xff]  ;;  %v571_v52 = vld [vmem:[#allocation5 + $0x20] sm:$0xff] }
  0x5c   :  { %1217 = vmatpush3.bf16.msra.mxu0 %v1216_v4  ;;  %v657_v39 = vld [vmem:[#allocation5 + $0x2d0] sm:$0xff]  ;;  %v572_v48 = vld [vmem:[#allocation5 + $0x28] sm:$0xff] }
  0x5d   :  { %1219 = vmatprep.subr.bf16.mxu0 %v1218_v5  ;;  %v649_v28 = vld [vmem:[#allocation5 + $0x290] sm:$0xff]  ;;  %v656_v29 = vld [vmem:[#allocation5 + $0x2c8] sm:$0xff] }
  0x5e   :  { %1244 = vmatpush3.bf16.msra.mxu1 %v1243_v37  ;;  %v616_v37 = vld [vmem:[#allocation5 + $0x188] sm:$0xff] }
  0x5f   :  { %1245 = vmatprep.subr.bf16.mxu1 %v1475_v25 }
  0x60   :  { %1221 = vmatpush3.bf16.msra.mxu0 %v1220_v10  ;;  %v568_v10 = vld [vmem:[#allocation5 + $0x8] sm:$0xff] }
  0x61   :  { %1223 = vmatprep.subr.bf16.mxu0 %v1222_v11  ;;  %v574_v11 = vld [vmem:[#allocation5 + $0x38] sm:$0xff] }
  0x62   :  { %1247 = vmatpush3.bf16.msra.mxu1 %v1246_v40  ;;  %v1266_v13 = vpack.c.bf16 %v574_v11, %v568_v10  ;;  %v1282_v40 = vpack.c.bf16 %v622_v38, %v616_v37  ;;  %v606_v10 = vld [vmem:[#allocation5 + $0x138] sm:$0xff]  ;;  %v612_v11 = vld [vmem:[#allocation5 + $0x168] sm:$0xff]  ;;  %v651_v38 = vld [vmem:[#allocation5 + $0x2a0] sm:$0xff] }
  0x63   :  { %1248 = vmatprep.subr.bf16.mxu1 %v1475_v25  ;;  %v1296_v41 = vpack.c.bf16 %v657_v39, %v651_v38 }
  0x64   :  { %1225 = vmatpush3.bf16.msra.mxu0 %v1224_v16  ;;  %v576_v16 = vld [vmem:[#allocation5 + $0x48] sm:$0xff] }
  0x65   :  { %1227 = vmatprep.subr.bf16.mxu0 %v1226_v17  ;;  %v1268_v17 = vpack.c.bf16 %v573_v14, %v567_v12  ;;  %v1298_v18 = vpack.c.bf16 %v576_v16, %v570_v15  ;;  %v605_v14 = vld [vmem:[#allocation5 + $0x130] sm:$0xff]  ;;  %v611_v15 = vld [vmem:[#allocation5 + $0x160] sm:$0xff]  ;;  %v618_v16 = vld [vmem:[#allocation5 + $0x198] sm:$0xff] }
  0x66   :  { %1250 = vmatpush3.bf16.msra.mxu1 %v1249_v43  ;;  %v628_v43 = vld [vmem:[#allocation5 + $0x1e8] sm:$0xff] }
  0x67   :  { %1251 = vmatprep.subr.bf16.mxu1 %v1475_v25 }
  0x68   :  { %1229 = vmatpush3.bf16.msra.mxu0 %v1228_v20  ;;  %v586_v20 = vld [vmem:[#allocation5 + $0x98] sm:$0xff] }
  0x69   :  { %1254 = vmatprep.subr.bf16.mxu0 %v1475_v25  ;;  %v1270_v23 = vpack.c.bf16 %v586_v20, %v580_v19  ;;  %v617_v20 = vld [vmem:[#allocation5 + $0x190] sm:$0xff] }
  0x6a   :  { %1253 = vmatpush3.bf16.msra.mxu1 %v1252_v46  ;;  %v1286_v46 = vpack.c.bf16 %v634_v44, %v628_v43  ;;  %v653_v43 = vld [vmem:[#allocation5 + $0x2b0] sm:$0xff]  ;;  %v659_v44 = vld [vmem:[#allocation5 + $0x2e0] sm:$0xff] }
  0x6b   :  { %378 = vmatmul.mubr.f32.vlgmr.msra.gmra.mrb[2].mxu0 %v68_v21  ;;  %1267 = vmatprep.subr.bf16.mxu1 %v1266_v13  ;;  %v579_v21 = vld [vmem:[#allocation5 + $0x60] sm:$0xff]  ;;  %v1310_v13 = vpack.c.bf16 %v612_v11, %v606_v10  ;;  %v613_v11 = vld [vmem:[#allocation5 + $0x170] sm:$0xff] }
  0x6c   :  { %1131 = vmatprep.mubr.msk.f32.mxu0 %vm1476_vm0, %v1477_v47  ;;  %1256 = vmatpush3.bf16.msra.mxu0 %v1255_v51  ;;  %v1272_v24 = vpack.c.bf16 %v585_v22, %v579_v21  ;;  %v646_v51 = vld [vmem:[#allocation5 + $0x278] sm:$0xff]  ;;  %v623_v21 = vld [vmem:[#allocation5 + $0x1c0] sm:$0xff] }
  0x6d   :  { %1257 = vmatprep.subr.bf16.mxu0 %v1475_v25  ;;  %v630_v22 = vld [vmem:[#allocation5 + $0x1f8] sm:$0xff]  ;;  %v607_v10 = vld [vmem:[#allocation5 + $0x140] sm:$0xff] }
  0x70   :  { %1259 = vmatpush3.bf16.msra.mxu0 %v1258_v53  ;;  %v1290_v53 = vpack.c.bf16 %v646_v51, %v640_v50  ;;  %v947_v51 = vld [vmem:[%s1696_s6] ss:$0 sm:$0xff]  ;;  %s1478_s6 = smov [#allocation8]  }
  0x71   :  { %1260 = vmatprep.subr.bf16.mxu0 %v1475_v25  ;;  %s931_s16 = sshll.u32 %s1478_s6, 4  ;;  %s932_s16 = int_to_ptr.vmem [resolvable:$true] %s931_s16 }
  0x72   :  { %s1417_s17 = scalar_lea.vmem %s932_s16, 128  ;;  %p1422_p3 = scmp.lt.s32.totalorder %s932_s16, %s932_s16 }
  0x73   :  { %p1418_p2 = scmp.ne.s32.totalorder %s932_s16, %s1417_s17  ;;  %p1423_p4 = scmp.lt.s32.totalorder %s1417_s17, %s1417_s17 }
  0x74   :  { %1262 = vmatpush3.bf16.msra.mxu0 %v1261_v56  ;;  %v569_v56 = vld [vmem:[#allocation5 + $0x10] sm:$0xff] }
  0x75   :  { %1263 = vmatprep.subr.bf16.mxu0 %v1475_v25  ;;  %v592_v25 = vld [vmem:[#allocation5 + $0xc8] sm:$0xff]  ;;  %p1424_p5 = por %p1423_p4, %p1422_p3 }
  0x76   :  { %v1274_v27 = vpack.c.bf16 %v598_v26, %v592_v25  ;;  %v629_v26 = vld [vmem:[#allocation5 + $0x1f0] sm:$0xff] }
  0x77   :  { %p1425_p6 = pnand %p1424_p5, %p1418_p2 }
  0x78   :  { %1265 = vmatpush3.bf16.msra.mxu0 %v1264_v9  ;;  %v599_v9 = vld [vmem:[#allocation5 + $0x100] sm:$0xff] }
  0x79   :  { %1299 = vmatprep.subr.bf16.mxu0 %v1298_v18  ;;  %v1308_v12 = vpack.c.bf16 %v599_v9, %v593_v8  ;;  %v1312_v18 = vpack.c.bf16 %v611_v15, %v605_v14  ;;  %v1344_v14 = vpack.c.bf16 %v613_v11, %v607_v10 }
 0x11e   :  { %v981_v57 = vpop.f32.mrb[0].mxu0 }
 0x11f   :  { %v982_v59 = vpop.f32.mrb[1].mxu0 }
 0x120   :  { %v1016_v60 = vpop.f32.mrb[0].mxu1  ;;  %v983_v61 = vadd.f32 %v982_v59, %v981_v57  ;;  %v575_v57 = vld [vmem:[#allocation5 + $0x40] sm:$0xff]  ;;  %v582_v59 = vld [vmem:[#allocation5 + $0x78] sm:$0xff] }
 0x121   :  { %v1017_v62 = vpop.f32.mrb[1].mxu1 }
 0x122   :  { %v1018_v63 = vadd.f32 %v1017_v62, %v1016_v60  ;;  %v240_v0 = vadd.f32 %v983_v61, %v945_v58  ;;  %v946_v58 = vld [vmem:[%s1694_s4] ss:$0 sm:$0xff]  ;;  %v588_v60 = vld [vmem:[#allocation5 + $0xa8] sm:$0xff]  ;;  %v1300_v62 = vpack.c.bf16 %v575_v57, %v569_v56  ;;  %v590_v56 = vld [vmem:[#allocation5 + $0xb8] sm:$0xff] }
 0x124   :  { %v310_v1 = vadd.f32 %v1018_v63, %v240_v0 }
 0x13e   :  { %v1051_v2 = vpop.f32.mrb[2].mxu0 }
 0x13f   :  { %v1052_v3 = vpop.f32.mrb[3].mxu0 }
 0x140   :  { %v1053_v4 = vadd.f32 %v1052_v3, %v1051_v2  ;;  %v581_v2 = vld [vmem:[#allocation5 + $0x70] sm:$0xff]  ;;  %v587_v3 = vld [vmem:[#allocation5 + $0xa0] sm:$0xff] }
 0x142   :  { %v380_v5 = vadd.f32 %v1053_v4, %v310_v1  ;;  %v1302_v1 = vpack.c.bf16 %v588_v60, %v582_v59  ;;  %v594_v4 = vld [vmem:[#allocation5 + $0xd8] sm:$0xff] }
 0x144   :  { %v383_v6 = vmax.f32 %v380_v5, 0.0  ;;  %v600_v5 = vld [vmem:[#allocation5 + $0x108] sm:$0xff] }
 0x145   :  { %v1306_v7 = vpack.c.bf16 %v600_v5, %v594_v4  ;;  %v595_v4 = vld [vmem:[#allocation5 + $0xe0] sm:$0xff]  ;;  %v601_v5 = vld [vmem:[#allocation5 + $0x110] sm:$0xff] }
 0x146   :  { %1113 = vmatmul.mubr.f32.vlgmr.msra.gmra.mrb[2].mxu1 %v383_v6  ;;  %v1304_v6 = vpack.c.bf16 %v587_v3, %v581_v2  ;;  %v1340_v8 = vpack.c.bf16 %v601_v5, %v595_v4 }
 0x147   :  { %759 = vmatprep.mubr.f32.mxu1 %v1477_v47  ;;  %1269 = vmatpush1.bf16.msra.mxu1 %v1268_v17  ;;  %v624_v17 = vld [vmem:[#allocation5 + $0x1c8] sm:$0xff] }
 0x148   :  { %1271 = vmatprep.subr.bf16.mxu1 %v1270_v23  ;;  %v1314_v19 = vpack.c.bf16 %v624_v17, %v618_v16  ;;  %v636_v23 = vld [vmem:[#allocation5 + $0x228] sm:$0xff]  ;;  %v619_v16 = vld [vmem:[#allocation5 + $0x1a0] sm:$0xff] }
 0x149   :  { %v1318_v25 = vpack.c.bf16 %v636_v23, %v630_v22  ;;  %v632_v17 = vld [vmem:[#allocation5 + $0x208] sm:$0xff]  ;;  %v637_v22 = vld [vmem:[#allocation5 + $0x230] sm:$0xff] }
 0x14a   :  { %v644_v23 = vld [vmem:[#allocation5 + $0x268] sm:$0xff] }
 0x14b   :  { %1273 = vmatpush1.bf16.msra.mxu1 %v1272_v24  ;;  %v1316_v24 = vpack.c.bf16 %v623_v21, %v617_v20  ;;  %v631_v21 = vld [vmem:[#allocation5 + $0x200] sm:$0xff] }
 0x14c   :  { %1275 = vmatprep.subr.bf16.mxu1 %v1274_v27  ;;  %v635_v27 = vld [vmem:[#allocation5 + $0x220] sm:$0xff] }
 0x14f   :  { %1277 = vmatpush1.bf16.msra.mxu1 %v1276_v30  ;;  %v1320_v30 = vpack.c.bf16 %v635_v27, %v629_v26  ;;  %v643_v27 = vld [vmem:[#allocation5 + $0x260] sm:$0xff] }
 0x150   :  { %1279 = vmatprep.subr.bf16.mxu1 %v1278_v34  ;;  %v1324_v34 = vpack.c.bf16 %v647_v33, %v641_v32  ;;  %v655_v33 = vld [vmem:[#allocation5 + $0x2c0] sm:$0xff] }
 0x153   :  { %1281 = vmatpush1.bf16.msra.mxu1 %v1280_v36  ;;  %v658_v36 = vld [vmem:[#allocation5 + $0x2d8] sm:$0xff] }
 0x154   :  { %1283 = vmatprep.subr.bf16.mxu1 %v1282_v40  ;;  %v1294_v37 = vpack.c.bf16 %v658_v36, %v652_v35  ;;  %v654_v40 = vld [vmem:[#allocation5 + $0x2b8] sm:$0xff] }
 0x157   :  { %1285 = vmatpush1.bf16.msra.mxu1 %v1284_v42  ;;  %v660_v42 = vld [vmem:[#allocation5 + $0x2e8] sm:$0xff] }
 0x158   :  { %1287 = vmatprep.subr.bf16.mxu1 %v1286_v46  ;;  %v1326_v45 = vpack.c.bf16 %v660_v42, %v654_v40  ;;  %v1328_v46 = vpack.c.bf16 %v659_v44, %v653_v43 }
 0x15b   :  { %1289 = vmatpush1.bf16.msra.mxu1 %v1288_v49  ;;  %v578_v49 = vld [vmem:[#allocation5 + $0x58] sm:$0xff] }
 0x15c   :  { %1291 = vmatprep.subr.bf16.mxu1 %v1290_v53  ;;  %v1330_v50 = vpack.c.bf16 %v578_v49, %v572_v48  ;;  %v577_v53 = vld [vmem:[#allocation5 + $0x50] sm:$0xff] }
 0x15d   :  { %v1332_v59 = vpack.c.bf16 %v577_v53, %v571_v52 }
 0x15f   :  { %1293 = vmatpush1.bf16.msra.mxu1 %v1292_v55  ;;  %v584_v55 = vld [vmem:[#allocation5 + $0x88] sm:$0xff] }
 0x160   :  { %1295 = vmatprep.subr.bf16.mxu1 %v1294_v37 }
 0x163   :  { %1297 = vmatpush1.bf16.msra.mxu1 %v1296_v41 }
 0x164   :  { %1331 = vmatprep.subr.bf16.mxu1 %v1330_v50 }
 0x219   :  { %v473_v61 = vpop.f32.mrb[2].mxu1 }
 0x21a   :  { %v474_v63 = vadd.f32 %v946_v58, %v473_v61  ;;  %v1114_v0 = vpop.f32.mrb[3].mxu1  ;;  %v1334_v61 = vpack.c.bf16 %v590_v56, %v584_v55 }
 0x21b   :  { %v596_v0 = vld [vmem:[#allocation5 + $0xe8] sm:$0xff] }
 0x21c   :  { %1132 = vmatmul.mubr.msk.f32.vlgmr.msra.gmra.mrb[4].mxu0 %vm492_vm1, %v474_v63  ;;  %908 = vst.msk [vmem:[#allocation8] sm:$0xff] %vm492_vm1, %v474_v63  ;;  %v589_v63 = vld [vmem:[#allocation5 + $0xb0] sm:$0xff] }
 0x21d   :  { %1301 = vmatpush1.bf16.msra.mxu0 %v1300_v62  ;;  %830 = vmatprep.mubr.f32.mxu0 %v1477_v47  ;;  %v583_v62 = vld [vmem:[#allocation5 + $0x80] sm:$0xff] }
 0x21e   :  { %1303 = vmatprep.subr.bf16.mxu0 %v1302_v1  ;;  %v602_v1 = vld [vmem:[#allocation5 + $0x118] sm:$0xff]  ;;  %v1336_v2 = vpack.c.bf16 %v589_v63, %v583_v62 }
 0x21f   :  { %v1338_v3 = vpack.c.bf16 %v602_v1, %v596_v0 }
 0x221   :  { %1305 = vmatpush1.bf16.msra.mxu0 %v1304_v6  ;;  %v608_v6 = vld [vmem:[#allocation5 + $0x148] sm:$0xff] }
 0x222   :  { %1307 = vmatprep.subr.bf16.mxu0 %v1306_v7  ;;  %v614_v7 = vld [vmem:[#allocation5 + $0x178] sm:$0xff] }
 0x223   :  { %v1342_v9 = vpack.c.bf16 %v614_v7, %v608_v6 }
 0x225   :  { %1309 = vmatpush1.bf16.msra.mxu0 %v1308_v12  ;;  %v620_v12 = vld [vmem:[#allocation5 + $0x1a8] sm:$0xff] }
 0x226   :  { %1311 = vmatprep.subr.bf16.mxu0 %v1310_v13  ;;  %v626_v13 = vld [vmem:[#allocation5 + $0x1d8] sm:$0xff] }
 0x227   :  { %v1346_v15 = vpack.c.bf16 %v626_v13, %v620_v12 }
 0x229   :  { %1313 = vmatpush1.bf16.msra.mxu0 %v1312_v18  ;;  %v638_v18 = vld [vmem:[#allocation5 + $0x238] sm:$0xff] }
 0x22a   :  { %1315 = vmatprep.subr.bf16.mxu0 %v1314_v19  ;;  %v1350_v20 = vpack.c.bf16 %v638_v18, %v632_v17 }
 0x22d   :  { %1317 = vmatpush1.bf16.msra.mxu0 %v1316_v24  ;;  %v650_v24 = vld [vmem:[#allocation5 + $0x298] sm:$0xff] }
 0x22e   :  { %1319 = vmatprep.subr.bf16.mxu0 %v1318_v25  ;;  %v1352_v25 = vpack.c.bf16 %v637_v22, %v631_v21  ;;  %v1354_v26 = vpack.c.bf16 %v650_v24, %v644_v23 }
 0x231   :  { %1321 = vmatpush1.bf16.msra.mxu0 %v1320_v30  ;;  %v662_v30 = vld [vmem:[#allocation5 + $0x2f8] sm:$0xff] }
 0x232   :  { %1323 = vmatprep.subr.bf16.mxu0 %v1322_v31  ;;  %v1356_v31 = vpack.c.bf16 %v649_v28, %v643_v27  ;;  %v1358_v32 = vpack.c.bf16 %v662_v30, %v656_v29 }
 0x235   :  { %1325 = vmatpush1.bf16.msra.mxu0 %v1324_v34  ;;  %v661_v34 = vld [vmem:[#allocation5 + $0x2f0] sm:$0xff] }
 0x236   :  { %1327 = vmatprep.subr.bf16.mxu0 %v1326_v45  ;;  %v1360_v35 = vpack.c.bf16 %v661_v34, %v655_v33 }
 0x239   :  { %1329 = vmatpush1.bf16.msra.mxu0 %v1328_v46 }
 0x2ef   :  { %v562_v54 = vpop.f32.mrb[4].mxu0 }
 0x2f0   :  { %v563_v57 = vadd.f32 %v947_v51, %v562_v54  ;;  %v1133_v58 = vpop.f32.mrb[5].mxu0 }
 0x2f2   :  { %v566_v60 = vmax.f32 %v563_v57, 0.0 }
 0x2f4   :  { %760 = vmatmul.mubr.f32.vlgmr.msra.gmra.mrb[4].mxu1 %v566_v60  ;;  %831 = vmatmul.mubr.f32.vlgmr.msra.gmra.mrb[6].mxu0 %v566_v60 }
 0x2f5   :  { %1333 = vmatpush1.bf16.msra.mxu1 %v1332_v59  ;;  %901 = vmatprep.mubr.f32.mxu1 %v1477_v47  ;;  %v625_v47 = vld [vmem:[#allocation5 + $0x1d0] sm:$0xff] }
 0x2f6   :  { %1335 = vmatprep.subr.bf16.mxu1 %v1334_v61  ;;  %v1348_v19 = vpack.c.bf16 %v625_v47, %v619_v16 }
 0x2f9   :  { %1337 = vmatpush1.bf16.msra.mxu1 %v1336_v2 }
 0x2fa   :  { %1339 = vmatprep.subr.bf16.mxu1 %v1338_v3 }
 0x2fd   :  { %1341 = vmatpush1.bf16.msra.mxu1 %v1340_v8 }
 0x2fe   :  { %1343 = vmatprep.subr.bf16.mxu1 %v1342_v9 }
 0x301   :  { %1345 = vmatpush1.bf16.msra.mxu1 %v1344_v14 }
 0x302   :  { %1347 = vmatprep.subr.bf16.mxu1 %v1346_v15 }
 0x305   :  { %1349 = vmatpush1.bf16.msra.mxu1 %v1348_v19 }
 0x306   :  { %1351 = vmatprep.subr.bf16.mxu1 %v1350_v20 }
 0x309   :  { %1353 = vmatpush1.bf16.msra.mxu1 %v1352_v25 }
 0x30a   :  { %1355 = vmatprep.subr.bf16.mxu1 %v1354_v26 }
 0x30d   :  { %1357 = vmatpush1.bf16.msra.mxu1 %v1356_v31 }
 0x30e   :  { %1359 = vmatprep.subr.bf16.mxu1 %v1358_v32 }
 0x311   :  { %1361 = vmatpush1.bf16.msra.mxu1 %v1360_v35 }
 0x314   :  { %902 = vmatmul.mubr.f32.vlgmr.msra.gmra.mrb[6].mxu1 %v566_v60 }
 0x315   :  { %1428 = shalt.err (!%p1425_p6)
}
 0x316   :  { %s1429_s0 = scalar_lea.hbm %s1700_s10, 128 }
 0x317   :  { %p1430_p7 = scmp.ne.s32.totalorder %s1700_s10, %s1429_s0  ;;  %p1433_p8 = scmp.lt.u32.totalorder %s1429_s0, %s1700_s10 }
 0x319   :  { %p1435_p9 = pnand %p1433_p8, %p1430_p7 }
 0x31b   :  { %1438 = shalt.err (!%p1435_p9)
}
 0x31c   :  { %934 = dma.vmem_to_hbm [thread:$0]  %s932_s16, 128, %s1700_s10, [#allocation9]   ;;  %v665_v36 = vlaneseq  ;;  %v663_v40 = vld [vmem:[%s1698_s8] sm:$0x3f] }
 0x31d   :  { %s1479_s8 = smov [#allocation7]  }
 0x31e   :  { %v666_v37 = vshrl.u32 %v665_v36, 7  ;;  %s921_s10 = sshll.u32 %s1479_s8, 4  ;;  %s922_s10 = int_to_ptr.vmem [resolvable:$true] %s921_s10 }
 0x31f   :  { %s1439_s24 = scalar_lea.vmem %s922_s10, 768  ;;  %p1444_p11 = scmp.lt.s32.totalorder %s922_s10, %s922_s10 }
 0x320   :  { %v667_v38 = vsub.s32 0, %v666_v37  ;;  %v675_v39 = vsub.s32 2, %v666_v37  ;;  %v671_v41 = vsub.s32 1, %v666_v37  ;;  %v679_v42 = vsub.s32 3, %v666_v37  ;;  %p1440_p10 = scmp.ne.s32.totalorder %s922_s10, %s1439_s24  ;;  %p1445_p12 = scmp.lt.s32.totalorder %s1439_s24, %s1439_s24 }
 0x321   :  { %v683_v56 = vsub.s32 4, %v666_v37  ;;  %v687_v57 = vsub.s32 5, %v666_v37 }
 0x322   :  { %v668_v43 = vrot.slane %v663_v40, %v667_v38  ;;  %v676_v44 = vrot.slane %v663_v40, %v675_v39  ;;  %v672_v45 = vrot.slane %v663_v40, %v671_v41  ;;  %v680_v46 = vrot.slane %v663_v40, %v679_v42  ;;  %p1446_p13 = por %p1445_p12, %p1444_p11 }
 0x323   :  { %v684_v58 = vrot.slane %v663_v40, %v683_v56  ;;  %v688_v59 = vrot.slane %v663_v40, %v687_v57 }
 0x324   :  { %p1447_p0 = pnand %p1446_p13, %p1440_p10 }
 0x3c7   :  { %v761_v48 = vpop.f32.mrb[4].mxu1  ;;  %v832_v49 = vpop.f32.mrb[6].mxu0 }
 0x3c8   :  { %v762_v50 = vadd.f32 %v761_v48, %v668_v43  ;;  %v833_v51 = vadd.f32 %v832_v49, %v676_v44  ;;  %v763_v52 = vpop.f32.mrb[5].mxu1  ;;  %v834_v53 = vpop.f32.mrb[7].mxu0 }
 0x3c9   :  { %v764_v54 = vadd.f32 %v763_v52, %v672_v45  ;;  %v835_v55 = vadd.f32 %v834_v53, %v680_v46 }
 0x3ca   :  { %909 = vst [vmem:[#allocation7] sm:$0xff] %v762_v50  ;;  %911 = vst [vmem:[#allocation7 + $0x10] sm:$0xff] %v833_v51 }
 0x3cb   :  { %910 = vst [vmem:[#allocation7 + $0x8] sm:$0xff] %v764_v54  ;;  %912 = vst [vmem:[#allocation7 + $0x18] sm:$0xff] %v835_v55 }
 0x3e7   :  { %v903_v60 = vpop.f32.mrb[6].mxu1 }
 0x3e8   :  { %v904_v61 = vadd.f32 %v903_v60, %v684_v58  ;;  %v905_v62 = vpop.f32.mrb[7].mxu1 }
 0x3e9   :  { %v906_v63 = vadd.f32 %v905_v62, %v688_v59 }
 0x3ea   :  { %913 = vst [vmem:[#allocation7 + $0x20] sm:$0xff] %v904_v61 }
 0x3eb   :  { %914 = vst [vmem:[#allocation7 + $0x28] sm:$0xff] %v906_v63 }
 0x3ec   :  { %1450 = shalt.err (!%p1447_p0)
}
 0x3ed   :  { %s1451_s27 = scalar_lea.hbm %s1699_s9, 768 }
 0x3ee   :  { %p1452_p1 = scmp.ne.s32.totalorder %s1699_s9, %s1451_s27  ;;  %p1455_p2 = scmp.lt.u32.totalorder %s1451_s27, %s1699_s9 }
 0x3f0   :  { %p1457_p3 = pnand %p1455_p2, %p1452_p1 }
 0x3f2   :  { %1460 = shalt.err (!%p1457_p3)
}
 0x3f3   :  { %924 = dma.vmem_to_hbm [thread:$0]  %s922_s10, 768, %s1699_s9, [#allocation4]  }
 0x3f4   :  { %1465 = dma.done.wait [#allocation4], 768  }
 0x3f5   :  { %1466 = vsyncadd [#allocation4], 4294966528 }
 0x3f6   :  { %1467 = dma.done.wait [#allocation9], 128  }
 0x3f7   :  { %1468 = vsyncadd [#allocation9], 4294967168 }
 0x3f8   :  { %941 = vsyncpa [#allocation3], 1 }
 0x3f9   :  { %942 = vsyncpa [#allocation6], 1 }
 0x3fa   :  { %943 = vsyncpa [#allocation4], 1 }
 0x3fb   :  { %944 = vsyncpa [#allocation9], 1 }

</bundles_post_ra>
